<compile_context>
chip_gen: v7x
topology: tpu7x:2x2x1
jax: 0.10.0
libtpu: 0.0.40
codegen_flags: <defaults>
</compile_context>

<pallas_src>
import functools

import jax
import jax.numpy as jnp
from jax.experimental import pallas as pl
from jax.experimental.pallas import tpu as pltpu


# ----------------------------------------------------------------------------
# Kernel 1: global average + max pooling over the spatial axis.
# x is viewed as (R, HW) with R = N*C; each row reduces independently.
# ----------------------------------------------------------------------------
def pool_kernel(x_ref, avg_ref, max_ref, sum_sc, max_sc, *,
                hw, chunk, needs_mask, inv_hw):
    s = pl.program_id(1)

    @pl.when(s == 0)
    def _init():
        sum_sc[...] = jnp.zeros_like(sum_sc)
        max_sc[...] = jnp.full_like(max_sc, -jnp.inf)

    x = x_ref[...].astype(jnp.float32)                     # (row_block, chunk)

    if needs_mask:
        # Ragged spatial tail: padded lanes must not pollute sum / max.
        col = s * chunk + jax.lax.broadcasted_iota(jnp.int32, x.shape, 1)
        valid = col < hw
        x_sum = jnp.where(valid, x, 0.0)
        x_max = jnp.where(valid, x, -jnp.inf)
    else:
        x_sum = x
        x_max = x

    sum_sc[...] = sum_sc[...] + jnp.sum(x_sum, axis=-1, keepdims=True)
    max_sc[...] = jnp.maximum(max_sc[...], jnp.max(x_max, axis=-1, keepdims=True))

    @pl.when(s == pl.num_programs(1) - 1)
    def _finalize():
        avg_ref[...] = (sum_sc[...] * inv_hw).astype(avg_ref.dtype)
        max_ref[...] = max_sc[...].astype(max_ref.dtype)


# ----------------------------------------------------------------------------
# Kernel 2: shared MLP (fc1 -> ReLU -> fc2) on both pooled vectors + sigmoid.
# Everything here is tiny ((N, C) with hidden = C // ratio), whole arrays in
# VMEM, single invocation, off the bandwidth-critical path.
# ----------------------------------------------------------------------------
def mlp_kernel(avg_ref, max_ref, w1_ref, w2_ref, o_ref):
    avg = avg_ref[...].astype(jnp.float32)                 # (N, C)
    mx = max_ref[...].astype(jnp.float32)                  # (N, C)
    w1 = w1_ref[...].astype(jnp.float32)                   # (C, hidden)
    w2 = w2_ref[...].astype(jnp.float32)                   # (hidden, C)

    def mlp(v):
        h = jnp.maximum(jnp.dot(v, w1, preferred_element_type=jnp.float32), 0.0)
        return jnp.dot(h, w2, preferred_element_type=jnp.float32)

    z = mlp(avg) + mlp(mx)
    o_ref[...] = (1.0 / (1.0 + jnp.exp(-z))).astype(o_ref.dtype)


# ----------------------------------------------------------------------------
# Tiling helpers
# ----------------------------------------------------------------------------
def _round_up(v, m):
    return ((v + m - 1) // m) * m


def _choose_row_block(r, itemsize):
    """Row-block (sublane) size: multiple of the packed-sublane tile, <= 512,
    and chosen so there are >= 2 (even count of) row-blocks when possible so
    the 'parallel' grid axis shards across v7x's two TensorCores."""
    base = {4: 8, 2: 16, 1: 32}.get(itemsize, 8)
    cap = 512
    if r <= base:
        return r                       # single (full-extent) block; can't split
    nb = max(2, pl.cdiv(r, cap))       # at least 2 blocks for megacore split
    if nb % 2:
        nb += 1                        # even block count balances the 2 TCs
    rb = _round_up(pl.cdiv(r, nb), base)
    return min(rb, cap)


# ----------------------------------------------------------------------------
# Forward wrapper (matches nn.ChannelAttention.forward semantics)
# ----------------------------------------------------------------------------
def channel_attention_forward(x, fc1_weight, fc2_weight,
                              target_block_bytes=8 * 1024 * 1024):
    """x: (N, C, H, W); fc1_weight: (C//ratio, C, 1, 1); fc2_weight: (C, C//ratio, 1, 1).

    Returns sigmoid attention weights of shape (N, C, 1, 1), like the PyTorch module.
    """
    N, C, H, W = x.shape
    hidden = fc1_weight.shape[0]
    R, HW = N * C, H * W
    itemsize = jnp.dtype(x.dtype).itemsize

    # NCHW -> (N*C, H*W) is a pure reshape (no relayout / HBM round trip).
    x2 = x.reshape(R, HW)
    # 1x1 conv weights -> matmul weights (tiny arrays).
    w1_t = fc1_weight.reshape(hidden, C).T                 # (C, hidden)
    w2_t = fc2_weight.reshape(C, hidden).T                 # (hidden, C)

    # Row (sublane) axis: balanced, >=2 blocks when possible; ragged tail OK.
    row_block = _choose_row_block(R, itemsize)
    num_row_blocks = pl.cdiv(R, row_block)

    # Spatial (lane) axis: ~target_block_bytes per input block, always a
    # multiple of 128 unless we can take the whole (budget-fitting) extent.
    chunk_cap = max(128, (target_block_bytes // (row_block * itemsize)) // 128 * 128)
    chunk = HW if HW <= chunk_cap else chunk_cap
    num_chunks = pl.cdiv(HW, chunk)
    needs_mask = (HW % chunk) != 0

    avg_r, max_r = pl.pallas_call(
        functools.partial(pool_kernel, hw=HW, chunk=chunk,
                          needs_mask=needs_mask, inv_hw=1.0 / HW),
        out_shape=(jax.ShapeDtypeStruct((R, 1), jnp.float32),
                   jax.ShapeDtypeStruct((R, 1), jnp.float32)),
        grid_spec=pltpu.PrefetchScalarGridSpec(
            num_scalar_prefetch=0,
            grid=(num_row_blocks, num_chunks),
            in_specs=[pl.BlockSpec((row_block, chunk), lambda r, s: (r, s))],
            out_specs=(pl.BlockSpec((row_block, 1), lambda r, s: (r, 0)),
                       pl.BlockSpec((row_block, 1), lambda r, s: (r, 0))),
            scratch_shapes=[pltpu.VMEM((row_block, 1), jnp.float32),
                            pltpu.VMEM((row_block, 1), jnp.float32)],
        ),
        compiler_params=pltpu.CompilerParams(
            dimension_semantics=("parallel", "arbitrary"),
            vmem_limit_bytes=48 * 1024 * 1024,
        ),
    )(x2)

    avg_nc = avg_r.reshape(N, C)
    max_nc = max_r.reshape(N, C)

    # Tiny fused MLP + sigmoid on whole-array VMEM refs (no grid needed).
    out_nc = pl.pallas_call(
        mlp_kernel,
        out_shape=jax.ShapeDtypeStruct((N, C), x.dtype),
    )(avg_nc, max_nc, w1_t, w2_t)

    return out_nc.reshape(N, C, 1, 1)


# ----------------------------------------------------------------------------
# Pure-JAX reference (mirrors the PyTorch module)
# ----------------------------------------------------------------------------
def channel_attention_reference(x, fc1_weight, fc2_weight):
    N, C, H, W = x.shape
    hidden = fc1_weight.shape[0]
    avg = jnp.mean(x, axis=(2, 3))                         # (N, C)
    mx = jnp.max(x, axis=(2, 3))                           # (N, C)
    w1 = fc1_weight.reshape(hidden, C)
    w2 = fc2_weight.reshape(C, hidden)

    def mlp(v):
        return jnp.maximum(v @ w1.T, 0.0) @ w2.T

    out = jax.nn.sigmoid(mlp(avg) + mlp(mx))
    return out.reshape(N, C, 1, 1)


if __name__ == "__main__":
    key = jax.random.PRNGKey(0)

    # Test 1: small shapes consistent with the module (ratio=16 => C multiple
    # of 16): N=2, C=32 (hidden=2), spatial 16x16. R=64 -> two row-blocks
    # (exercises the megacore-friendly split), HW=256 -> single chunk.
    N, C, H, W = 2, 32, 16, 16
    hidden = C // 16
    kx, k1, k2, key = jax.random.split(key, 4)
    x = jax.random.normal(kx, (N, C, H, W), dtype=jnp.float32)
    fc1_w = jax.random.normal(k1, (hidden, C, 1, 1), dtype=jnp.float32) * 0.1
    fc2_w = jax.random.normal(k2, (C, hidden, 1, 1), dtype=jnp.float32) * 0.1

    out = jax.block_until_ready(channel_attention_forward(x, fc1_w, fc2_w))
    ref = channel_attention_reference(x, fc1_w, fc2_w)
    assert out.shape == (N, C, 1, 1), out.shape
    assert jnp.allclose(out, ref, atol=1e-5, rtol=1e-5)

    # Test 2: awkward shapes exercising the ragged row-block (cdiv grid) and
    # masked ragged spatial tail (HW=225 split into 128-lane chunks by forcing
    # a tiny block-bytes budget). ratio=4 here so C=8, hidden=2; R=88.
    N2, C2, H2, W2 = 11, 8, 15, 15
    hidden2 = C2 // 4
    kx, k1, k2, key = jax.random.split(key, 4)
    x2 = jax.random.normal(kx, (N2, C2, H2, W2), dtype=jnp.float32)
    fc1_w2 = jax.random.normal(k1, (hidden2, C2, 1, 1), dtype=jnp.float32) * 0.1
    fc2_w2 = jax.random.normal(k2, (C2, hidden2, 1, 1), dtype=jnp.float32) * 0.1

    out2 = jax.block_until_ready(
        channel_attention_forward(x2, fc1_w2, fc2_w2, target_block_bytes=32 * 1024))
    ref2 = channel_attention_reference(x2, fc1_w2, fc2_w2)
    assert out2.shape == (N2, C2, 1, 1), out2.shape
    assert jnp.allclose(out2, ref2, atol=1e-5, rtol=1e-5)

    print("KERNEL_OK")
</pallas_src>

<mosaic_0001>
module attributes {stable_mosaic.version = 11 : i64} {
  func.func @pool_kernel(%arg0: i32, %arg1: i32, %arg2: memref<32x256xf32, #tpu.memory_space<vmem>>, %arg3: memref<32x1xf32, #tpu.memory_space<vmem>>, %arg4: memref<32x1xf32, #tpu.memory_space<vmem>>, %arg5: memref<32x1xf32, #tpu.memory_space<vmem>>, %arg6: memref<32x1xf32, #tpu.memory_space<vmem>>) attributes {dimension_semantics = [#tpu.dimension_semantics<parallel>, #tpu.dimension_semantics<arbitrary>], iteration_bounds = array<i64: 2, 1>, scalar_prefetch = 0 : i64, scratch_operands = 2 : i64, tpu.core_type = #tpu.core_type<tc>, window_params = [{transform_indices = @transform_0, window_bounds = array<i64: 32, 256>}, {transform_indices = @transform_1, window_bounds = array<i64: 32, 1>}, {transform_indices = @transform_2, window_bounds = array<i64: 32, 1>}]} {
    %c0_i32 = arith.constant 0 : i32
    %0 = arith.cmpi eq, %arg1, %c0_i32 : i32
    %1 = arith.extui %0 : i1 to i32
    %c0_i32_0 = arith.constant 0 : i32
    %2 = arith.cmpi ne, %1, %c0_i32_0 : i32
    scf.if %2 {
      %cst_13 = arith.constant 0.000000e+00 : f32
      %17 = vector.broadcast %cst_13 : f32 to vector<32x1xf32>
      %c0_14 = arith.constant 0 : index
      %c0_15 = arith.constant 0 : index
      %18 = vector.load %arg5[%c0_14, %c0_15] : memref<32x1xf32, #tpu.memory_space<vmem>>, vector<32x1xf32>
      tpu.vector_store %arg5[%c0_14, %c0_15], %17 {strides = array<i32>} : memref<32x1xf32, #tpu.memory_space<vmem>>, vector<32x1xf32>,
      %cst_16 = arith.constant 0xFF800000 : f32
      %19 = vector.broadcast %cst_16 : f32 to vector<32x1xf32>
      %c0_17 = arith.constant 0 : index
      %c0_18 = arith.constant 0 : index
      %20 = vector.load %arg6[%c0_17, %c0_18] : memref<32x1xf32, #tpu.memory_space<vmem>>, vector<32x1xf32>
      tpu.vector_store %arg6[%c0_17, %c0_18], %19 {strides = array<i32>} : memref<32x1xf32, #tpu.memory_space<vmem>>, vector<32x1xf32>,
    } else {
    }
    %c0 = arith.constant 0 : index
    %c0_1 = arith.constant 0 : index
    %3 = vector.load %arg2[%c0, %c0_1] : memref<32x256xf32, #tpu.memory_space<vmem>>, vector<32x256xf32>
    %c0_2 = arith.constant 0 : index
    %c0_3 = arith.constant 0 : index
    %4 = vector.load %arg5[%c0_2, %c0_3] : memref<32x1xf32, #tpu.memory_space<vmem>>, vector<32x1xf32>
    %cst = arith.constant dense<0.000000e+00> : vector<32xf32>
    %5 = vector.multi_reduction <add>, %3, %cst [1] : vector<32x256xf32> to vector<32xf32>
    %6 = vector.shape_cast %5 : vector<32xf32> to vector<32x1xf32>
    %7 = arith.addf %4, %6 : vector<32x1xf32>
    %c0_4 = arith.constant 0 : index
    %c0_5 = arith.constant 0 : index
    %8 = vector.load %arg5[%c0_4, %c0_5] : memref<32x1xf32, #tpu.memory_space<vmem>>, vector<32x1xf32>
    tpu.vector_store %arg5[%c0_4, %c0_5], %7 {strides = array<i32>} : memref<32x1xf32, #tpu.memory_space<vmem>>, vector<32x1xf32>,
    %c0_6 = arith.constant 0 : index
    %c0_7 = arith.constant 0 : index
    %9 = vector.load %arg6[%c0_6, %c0_7] : memref<32x1xf32, #tpu.memory_space<vmem>>, vector<32x1xf32>
    %cst_8 = arith.constant dense<0xFF800000> : vector<32xf32>
    %10 = vector.multi_reduction <maximumf>, %3, %cst_8 [1] : vector<32x256xf32> to vector<32xf32>
    %11 = vector.shape_cast %10 : vector<32xf32> to vector<32x1xf32>
    %12 = arith.maximumf %9, %11 : vector<32x1xf32>
    %c0_9 = arith.constant 0 : index
    %c0_10 = arith.constant 0 : index
    %13 = vector.load %arg6[%c0_9, %c0_10] : memref<32x1xf32, #tpu.memory_space<vmem>>, vector<32x1xf32>
    tpu.vector_store %arg6[%c0_9, %c0_10], %12 {strides = array<i32>} : memref<32x1xf32, #tpu.memory_space<vmem>>, vector<32x1xf32>,
    %c0_i32_11 = arith.constant 0 : i32
    %14 = arith.cmpi eq, %arg1, %c0_i32_11 : i32
    %15 = arith.extui %14 : i1 to i32
    %c0_i32_12 = arith.constant 0 : i32
    %16 = arith.cmpi ne, %15, %c0_i32_12 : i32
    scf.if %16 {
      %c0_13 = arith.constant 0 : index
      %c0_14 = arith.constant 0 : index
      %17 = vector.load %arg5[%c0_13, %c0_14] : memref<32x1xf32, #tpu.memory_space<vmem>>, vector<32x1xf32>
      %cst_15 = arith.constant 3.906250e-03 : f32
      %18 = vector.broadcast %cst_15 : f32 to vector<32x1xf32>
      %19 = arith.mulf %17, %18 : vector<32x1xf32>
      %c0_16 = arith.constant 0 : index
      %c0_17 = arith.constant 0 : index
      %20 = vector.load %arg3[%c0_16, %c0_17] : memref<32x1xf32, #tpu.memory_space<vmem>>, vector<32x1xf32>
      tpu.vector_store %arg3[%c0_16, %c0_17], %19 {strides = array<i32>} : memref<32x1xf32, #tpu.memory_space<vmem>>, vector<32x1xf32>,
      %c0_18 = arith.constant 0 : index
      %c0_19 = arith.constant 0 : index
      %21 = vector.load %arg6[%c0_18, %c0_19] : memref<32x1xf32, #tpu.memory_space<vmem>>, vector<32x1xf32>
      %c0_20 = arith.constant 0 : index
      %c0_21 = arith.constant 0 : index
      %22 = vector.load %arg4[%c0_20, %c0_21] : memref<32x1xf32, #tpu.memory_space<vmem>>, vector<32x1xf32>
      tpu.vector_store %arg4[%c0_20, %c0_21], %21 {strides = array<i32>} : memref<32x1xf32, #tpu.memory_space<vmem>>, vector<32x1xf32>,
    } else {
    }
    return
  }
  func.func @transform_0(%arg0: i32, %arg1: i32) -> (i32, i32) {
    %c0_i32 = arith.constant 0 : i32
    return %arg0, %arg1 : i32, i32
  }
  func.func @transform_1(%arg0: i32, %arg1: i32) -> (i32, i32) {
    %c0_i32 = arith.constant 0 : i32
    %c0_i32_0 = arith.constant 0 : i32
    return %arg0, %c0_i32 : i32, i32
  }
  func.func @transform_2(%arg0: i32, %arg1: i32) -> (i32, i32) {
    %c0_i32 = arith.constant 0 : i32
    %c0_i32_0 = arith.constant 0 : i32
    return %arg0, %c0_i32 : i32, i32
  }
}

</mosaic_0001>

<bundles_post_ra>
// kernel: tpu_custom_call.1
= control target key start
LH: loop header
LB: loop body
LE: loop exit
PB: predicated region body
PF: predicated region fallthrough
CT: control target
= control target key end

     0   :  { %8 = vsyncpa [#allocation5], 0  ;;  %s733_s0 = inlined_call_operand.hbm [shape: f32[64,256], index: 0, kind: input, shape index: {}]   ;;  %s734_s1 = inlined_call_operand.vmem [shape: f32[64,1], index: 1, kind: output, shape index: {0}]   ;;  %s735_s2 = inlined_call_operand.vmem [shape: f32[64,1], index: 2, kind: output, shape index: {1}]  }
   0x1   :  { %10 = vsyncpa [#allocation5 + $0x1], 0  ;;  %s583_s9 = smov 0   ;;  %s585_s10 = smov 0  }
   0x2   :  { %s587_s11 = smov 0   ;;  %s589_s12 = smov 0  }
   0x3   :  { %s591_s13 = smov 0   ;;  %s593_s14 = smov 0  }
   0x4 LB: > { %s404_s15 = sadd.s32 4294967295, %s561_s14   ;;  %s28_s16 = sadd.s32 1, %s557_s13  ;;  %s561_s14 = sphi %s593_s14, %s16_s14   ;;  %s557_s13 = sphi %s591_s13, %s743_s13   ;;  %s553_s12 = sphi %s589_s12, %s742_s12   ;;  %s549_s11 = sphi %s587_s11, %s741_s11   ;;  %s545_s10 = sphi %s585_s10, %s740_s10   ;;  %s541_s9 = sphi %s583_s9, %s739_s9  }
   0x5   : > { %p30_p0 = scmp.ge.s32.totalorder %s28_s16, 2  ;;  %s37_s17 = sadd.s32 1, %s549_s11 }
   0x6   : > { %p44_p1 = scmp.ne.s32.totalorder %s549_s11, %s545_s10  ;;  %p45_p2 = scmp.eq.s32.totalorder %s561_s14, 0 }
   0x7   : > { %s745_s16 = smov (%p30_p0, %s28_s16), 0  ;;  %p50_p4 = scmp.ne.s32.totalorder %s545_s10, %s541_s9 }
   0x8   : > { %p619_p3 = por %p45_p2, %p44_p1  ;;  %s32_s19 = ssub.s32 %s557_s13, %s745_s16 }
   0x9   : > { %p51_p5 = scmp.eq.s32.totalorder %s404_s15, 0  ;;  %p35_p6 = scmp.eq.s32.totalorder %s32_s19, 0 }
   0xa   : > { %p428_p8 = scmp.lt.s32.totalorder %s561_s14, 2  ;;  %s126_s22 = sand.u32 1, %s549_s11  }
   0xb   : > { %p626_p7 = por %p51_p5, %p50_p4  ;;  %s421_s23 = sshll.u32 %s557_s13, 10 }
   0xc   : > { %s632_s21 = scalar_select %p35_p6, %s549_s11, %s37_s17  }
   0xd   : > { %s408_s24 = sshll.u32 %s126_s22, 6  ;;  %s639_s27 = scalar_lea.hbm %s733_s0, %s421_s23 }
   0xe   : > { %s130_s28 = scalar_lea.vmem [#allocation4], %s408_s24  ;;  %p643_p9 = pnand %p428_p8, %p619_p3 }
   0xf   : > { %s140_s29 = sshll.u32 %s130_s28, 4  ;;  %s649_s3 = scalar_lea.sflag [#allocation5], %s126_s22  ;;  %s647_s29 = int_to_ptr.vmem [resolvable:$true] %s140_s29 }
  0x10   : > { %s481_s4 = scalar_lea.hbm %s639_s27, 1024  ;;  %p483_p11 = pneg %p643_p9 }
  0x11   : > { %p482_p10 = scmp.ne.s32.totalorder %s639_s27, %s481_s4  ;;  %s486_s7 = scalar_lea.hbm %s733_s0, 2048 }
  0x12   : > { %p487_p0 = scmp.lt.u32.totalorder %s639_s27, %s733_s0  ;;  %p488_p1 = scmp.lt.u32.totalorder %s486_s7, %s481_s4 }
  0x13   : > { %p484_p12 = pnand %p483_p11, %p482_p10  ;;  %p490_p3 = scmp.lt.u32.totalorder %s481_s4, %s639_s27 }
  0x14   : > { %p489_p2 = por %p488_p1, %p487_p0 }
  0x15   : > { %p485_p13 = pneg %p484_p12 }
  0x16   : > { %p491_p4 = por %p490_p3, %p489_p2 }
  0x18   : > { %p492_p5 = pnand %p491_p4, %p485_p13 }
  0x1a   : > { %495 = shalt.err (!%p492_p5)
}
  0x1b   : > { %s496_s15 = scalar_lea.vmem %s647_s29, 1024  ;;  %s563_s17 = smov [#allocation4]  }
  0x1c   : > { %p497_p6 = scmp.ne.s32.totalorder %s647_s29, %s496_s15  ;;  %s501_s18 = sshll.u32 %s563_s17, 4  ;;  %s502_s18 = int_to_ptr.vmem [resolvable:$false] %s501_s18 }
  0x1d   : > { %s503_s19 = scalar_lea.vmem %s502_s18, 2048  ;;  %p504_p12 = scmp.lt.s32.totalorder %s647_s29, %s502_s18 }
  0x1e   : > { %p499_p8 = pnand %p497_p6, %p483_p11  ;;  %p505_p0 = scmp.lt.s32.totalorder %s503_s19, %s496_s15 }
  0x20   : > { %p500_p10 = pneg %p499_p8  ;;  %p506_p1 = por %p505_p0, %p504_p12 }
  0x22   : > { %p507_p2 = pnand %p506_p1, %p500_p10 }
  0x24   : > { %510 = shalt.err (!%p507_p2)
}
  0x25   : > { %s564_s22 = smov 256   ;;  %s565_s23 = smov 16  }
  0x26   : > { %427 = dma.hbm_to_vmem [thread:$0]  (!%p643_p9), %s639_s27, 1024, %s647_s29, %s649_s3, %s564_s22, %s564_s22, %s565_s23  }
  0x27   : > { %p412_p11 = scmp.ge.s32.totalorder %s561_s14, 1  ;;  %p148_p13 = scmp.lt.s32.totalorder %s561_s14, 3 }
  0x29   : > { %p149_p3 = pnand %p412_p11, %p148_p13 }
  0x2a   : > { %s154_s24 = sand.u32 (!%p149_p3), 1, %s545_s10  }
  0x2b   : > { %152 = sbr.rel (%p149_p3) target bundleno = 220 (0xdc), region = 24  ;;  %s413_s25 = sshll.u32 (!%p149_p3), %s154_s24, 6 }
  0x2c   : > { %s155_s26 = scalar_lea.sflag (!%p149_p3), [#allocation5], %s154_s24  ;;  %s158_s28 = scalar_lea.vmem (!%p149_p3), [#allocation4], %s413_s25 }
  0x32   : > { %536 = dma.done.wait (%p626_p7), %s155_s26, 1024  }
  0x33   : > { %538 = vsyncadd (%p626_p7), %s155_s26, 4294966272  ;;  %vm202_vm0 = vcmask 7168   ;;  %v566_v0 = vmov 0.0   ;;  %v211_v1 = vld [vmem:[%s158_s28] sm:$0xff]  ;;  %v212_v2 = vld [vmem:[%s158_s28 + $0x8] sm:$0xff]  ;;  %v567_v17 = vmov -inf  }
  0x34   : > { %203 = vst.msk [vmem:[#allocation2] sm:$0xff] %vm202_vm0, %v566_v0  ;;  %204 = vst.msk [vmem:[#allocation2 + $0x8] sm:$0xff] %vm202_vm0, %v566_v0  ;;  %v215_v3 = vld [vmem:[%s158_s28 + $0x20] sm:$0xff]  ;;  %v223_v4 = vadd.f32 %v212_v2, %v211_v1  ;;  %v216_v5 = vld [vmem:[%s158_s28 + $0x28] sm:$0xff]  ;;  %v248_v10 = vmax.f32 %v211_v1, %v212_v2  ;;  %s414_s20 = sshll.u32 %s553_s12, 2 }
  0x35   : > { %205 = vst.msk [vmem:[#allocation2 + $0x10] sm:$0xff] %vm202_vm0, %v566_v0  ;;  %206 = vst.msk [vmem:[#allocation2 + $0x18] sm:$0xff] %vm202_vm0, %v566_v0  ;;  %v213_v6 = vld [vmem:[%s158_s28 + $0x10] sm:$0xff]  ;;  %v214_v7 = vld [vmem:[%s158_s28 + $0x18] sm:$0xff]  ;;  %v229_v8 = vadd.f32 %v216_v5, %v215_v3  ;;  %v254_v15 = vmax.f32 %v215_v3, %v216_v5  ;;  %p187_p7 = scmp.lt.s32.totalorder %s414_s20, 7 }
  0x36   : > { %224 = vadd.xlane.f32.xlu0 %v223_v4  ;;  %v226_v9 = vadd.f32 %v214_v7, %v213_v6  ;;  %v217_v11 = vld [vmem:[%s158_s28 + $0x30] sm:$0xff]  ;;  %v218_v12 = vld [vmem:[%s158_s28 + $0x38] sm:$0xff]  ;;  %v251_v14 = vmax.f32 %v213_v6, %v214_v7  ;;  %207 = vst.msk [vmem:[#allocation3] sm:$0xff] %vm202_vm0, %v567_v17  ;;  %208 = vst.msk [vmem:[#allocation3 + $0x8] sm:$0xff] %vm202_vm0, %v567_v17 }
  0x37   : > { %230 = vadd.xlane.f32.xlu1 %v229_v8  ;;  %v232_v13 = vadd.f32 %v218_v12, %v217_v11  ;;  %v257_v16 = vmax.f32 %v217_v11, %v218_v12  ;;  %209 = vst.msk [vmem:[#allocation3 + $0x10] sm:$0xff] %vm202_vm0, %v567_v17  ;;  %210 = vst.msk [vmem:[#allocation3 + $0x18] sm:$0xff] %vm202_vm0, %v567_v17  ;;  %s747_s20 = smov (!%p187_p7, %s414_s20), 7 }
  0x38   : > { %s415_s12 = sshll.u32 %s747_s20, 3 }
  0x39   : > { %s190_s30 = scalar_lea.vmem %s734_s1, %s415_s12  ;;  %s196_s5 = scalar_lea.vmem %s735_s2, %s415_s12 }
  0x3a   : > { %227 = vadd.xlane.f32.xlu0 %v226_v9 }
  0x3b   : > { %249 = vmax.xlane.f32.xlu1 %v248_v10  ;;  %v219_v18 = vld [vmem:[#allocation2] sm:$0xff]  ;;  %v220_v24 = vld [vmem:[#allocation2 + $0x8] sm:$0xff] }
  0x3c   : > { %v221_v19 = vld [vmem:[#allocation2 + $0x10] sm:$0xff]  ;;  %v222_v30 = vld [vmem:[#allocation2 + $0x18] sm:$0xff] }
  0x3d   : > { %v244_v25 = vld [vmem:[#allocation3] sm:$0xff]  ;;  %v245_v31 = vld [vmem:[#allocation3 + $0x8] sm:$0xff] }
  0x3e   : > { %233 = vadd.xlane.f32.xlu0 %v232_v13  ;;  %v246_v37 = vld [vmem:[#allocation3 + $0x10] sm:$0xff]  ;;  %v247_v39 = vld [vmem:[#allocation3 + $0x18] sm:$0xff] }
  0x3f   : > { %252 = vmax.xlane.f32.xlu1 %v251_v14 }
  0x42   : > { %255 = vmax.xlane.f32.xlu0 %v254_v15 }
  0x43   : > { %258 = vmax.xlane.f32.xlu1 %v257_v16 }
  0xc3   : > { %v225_v20 = vpop.xlane.xlu0 %224 }
  0xc4   : > { %v235_v21 = vadd.f32 %v225_v20, %v219_v18  ;;  %v231_v22 = vpop.xlane.xlu1 %230 }
  0xc5   : > { %v237_v23 = vadd.f32 %v231_v22, %v221_v19 }
  0xc6   : > { %240 = vst.msk [vmem:[#allocation2] sm:$0xff] %vm202_vm0, %v235_v21 }
  0xc7   : > { %242 = vst.msk [vmem:[#allocation2 + $0x10] sm:$0xff] %vm202_vm0, %v237_v23  ;;  %v228_v26 = vpop.xlane.xlu0 %227 }
  0xc8   : > { %v236_v27 = vadd.f32 %v228_v26, %v220_v24  ;;  %v250_v28 = vpop.xlane.xlu1 %249 }
  0xc9   : > { %v260_v29 = vmax.f32 %v244_v25, %v250_v28 }
  0xca   : > { %241 = vst.msk [vmem:[#allocation2 + $0x8] sm:$0xff] %vm202_vm0, %v236_v27 }
  0xcb   : > { %264 = vst.msk [vmem:[#allocation3] sm:$0xff] %vm202_vm0, %v260_v29  ;;  %v234_v32 = vpop.xlane.xlu0 %233 }
  0xcc   : > { %v238_v33 = vadd.f32 %v234_v32, %v222_v30  ;;  %v253_v34 = vpop.xlane.xlu1 %252 }
  0xcd   : > { %v271_v35 = vld [vmem:[#allocation2] sm:$0xff]  ;;  %v261_v36 = vmax.f32 %v245_v31, %v253_v34 }
  0xce   : > { %v275_v38 = vmul.f32 0.00390625, %v271_v35  ;;  %243 = vst.msk [vmem:[#allocation2 + $0x18] sm:$0xff] %vm202_vm0, %v238_v33  ;;  %v273_v41 = vld [vmem:[#allocation2 + $0x10] sm:$0xff] }
  0xcf   : > { %265 = vst.msk [vmem:[#allocation3 + $0x8] sm:$0xff] %vm202_vm0, %v261_v36  ;;  %v256_v40 = vpop.xlane.xlu0 %255  ;;  %v277_v48 = vmul.f32 0.00390625, %v273_v41 }
  0xd0   : > { %279 = vst.msk [vmem:[%s190_s30] sm:$0xff] %vm202_vm0, %v275_v38  ;;  %v262_v42 = vmax.f32 %v246_v37, %v256_v40  ;;  %v259_v43 = vpop.xlane.xlu1 %258 }
  0xd1   : > { %v272_v44 = vld [vmem:[#allocation2 + $0x8] sm:$0xff]  ;;  %v263_v45 = vmax.f32 %v247_v39, %v259_v43  ;;  %281 = vst.msk [vmem:[%s190_s30 + $0x10] sm:$0xff] %vm202_vm0, %v277_v48 }
  0xd2   : > { %v276_v46 = vmul.f32 0.00390625, %v272_v44  ;;  %v283_v47 = vld [vmem:[#allocation3] sm:$0xff]  ;;  %266 = vst.msk [vmem:[#allocation3 + $0x10] sm:$0xff] %vm202_vm0, %v262_v42 }
  0xd3   : > { %287 = vst.msk [vmem:[%s196_s5] sm:$0xff] %vm202_vm0, %v283_v47  ;;  %267 = vst.msk [vmem:[#allocation3 + $0x18] sm:$0xff] %vm202_vm0, %v263_v45 }
  0xd4   : > { %280 = vst.msk [vmem:[%s190_s30 + $0x8] sm:$0xff] %vm202_vm0, %v276_v46 }
  0xd5   : > { %v274_v49 = vld [vmem:[#allocation2 + $0x18] sm:$0xff] }
  0xd6   : > { %v278_v50 = vmul.f32 0.00390625, %v274_v49  ;;  %v284_v51 = vld [vmem:[#allocation3 + $0x8] sm:$0xff] }
  0xd7   : > { %288 = vst.msk [vmem:[%s196_s5 + $0x8] sm:$0xff] %vm202_vm0, %v284_v51 }
  0xd8   : > { %282 = vst.msk [vmem:[%s190_s30 + $0x18] sm:$0xff] %vm202_vm0, %v278_v50 }
  0xd9   : > { %v285_v52 = vld [vmem:[#allocation3 + $0x10] sm:$0xff] }
  0xda   : > { %289 = vst.msk [vmem:[%s196_s5 + $0x10] sm:$0xff] %vm202_vm0, %v285_v52  ;;  %v286_v53 = vld [vmem:[#allocation3 + $0x18] sm:$0xff] }
  0xdb   : > { %290 = vst.msk [vmem:[%s196_s5 + $0x18] sm:$0xff] %vm202_vm0, %v286_v53 }
  0xdc PF: > { %s16_s14 = sadd.s32 1, %s561_s14   ;;  %s739_s9 = smov %s545_s10 }
  0xdd   : > { %p13_p9 = scmp.ge.s32.totalorder %s16_s14, 4   ;;  %s740_s10 = smov %s549_s11 }
  0xde   : > { %s741_s11 = smov %s632_s21  ;;  %s742_s12 = smov %s557_s13 }
  0xdf   : > { %s743_s13 = smov %s745_s16  ;;  %15 = sbr.rel (!%p13_p9) target bundleno = 4 (0x4), region = 84 }
  0xe6   :  { %330 = vsyncpa [#allocation5], 1 }
  0xe7   :  { %332 = vsyncpa [#allocation5 + $0x1], 1 }

</bundles_post_ra>
